<compile_context>
chip_gen: v7x
topology: tpu7x:2x2x1
jax: 0.10.0
libtpu: 0.0.40
codegen_flags: <defaults>
</compile_context>

<pallas_src>
import functools

import numpy as np
import jax
import jax.numpy as jnp
from jax.experimental import pallas as pl
from jax.experimental.pallas import tpu as pltpu


def _nearest_src_indices(h_pooled, txt_length):
    # Emulate PyTorch F.interpolate(mode='nearest'):
    #   src = min(floor(l * (in/out)), in-1), with the scale computed in float32.
    scale = np.float32(h_pooled) / np.float32(txt_length)
    idx = np.floor(np.arange(txt_length, dtype=np.float32) * scale).astype(np.int64)
    return np.minimum(idx, h_pooled - 1)


def ms_block_kernel(x_ref, mt_ref, b_ref, o_ref, *, inv_pool_k):
    # x_ref : (Nb, Cin*H)       block of Nb images, flattened (channel, height)
    # mt_ref: (Cin*H, Cout*L)   kron(W, A_mask)^T, shared across grid steps
    # b_ref : (1, Cout*L)       bias repeated over the L positions
    # o_ref : (Nb, Cout*L)      lane-dense output block
    z = jnp.dot(x_ref[...], mt_ref[...], preferred_element_type=jnp.float32)
    o_ref[...] = jnp.maximum(z * inv_pool_k + b_ref[...], 0.0)


def ms_block_forward(x_nchw, weight, bias, pool_level, txt_length, block_n=None):
    """x_nchw: (N, Cin, H, 1) f32.  weight: (Cout, Cin, 1, 1).  bias: (Cout,)."""
    n, cin, h, w_spatial = x_nchw.shape
    assert w_spatial == 1, "MS_Block expects width == 1"
    cout = weight.shape[0]

    pool_k = 5 * pool_level
    h_pooled = (h - pool_k) // pool_k + 1          # AvgPool2d floor mode
    assert h_pooled >= 1
    inv_pool_k = 1.0 / float(pool_k)

    # Static 0/1 matrix: A_mask[l, h] = 1 iff h lies in the pool window chosen
    # by nearest-upsample output row l.  Rows of x beyond h_pooled*pool_k get
    # zero weight (matches AvgPool2d floor mode).
    src = _nearest_src_indices(h_pooled, txt_length)
    a_mask = np.zeros((txt_length, h), dtype=np.float32)
    for l, p in enumerate(src):
        a_mask[l, p * pool_k:(p + 1) * pool_k] = 1.0

    w_mat = weight.reshape(cout, cin)                                # (Cout, Cin)
    # kron(W, A)[o*L + l, c*H + h] = W[o, c] * A[l, h]
    m = jnp.kron(w_mat, jnp.asarray(a_mask))                         # (Cout*L, Cin*H)
    mt = m.T                                                         # (Cin*H, Cout*L)
    b_row = jnp.repeat(bias, txt_length).reshape(1, cout * txt_length)

    # Batch blocking: pack as many images per step as possible while keeping
    # >= 2 grid steps (both v7x TensorCores) when the batch allows.
    if block_n is None:
        block_n = n // 2 if (n >= 2 and n % 2 == 0) else 1
    assert n % block_n == 0, "block_n must divide batch"
    grid_n = n // block_n

    cinh = cin * h
    coutl = cout * txt_length

    # Free, contiguous reshapes only — no HBM transposes.
    x_blk = x_nchw.reshape(grid_n, block_n, cinh)

    kernel = functools.partial(ms_block_kernel, inv_pool_k=inv_pool_k)
    out = pl.pallas_call(
        kernel,
        out_shape=jax.ShapeDtypeStruct((grid_n, block_n, coutl), jnp.float32),
        grid=(grid_n,),
        in_specs=[
            pl.BlockSpec((None, block_n, cinh), lambda i: (i, 0, 0)),  # X block
            pl.BlockSpec((cinh, coutl), lambda i: (0, 0)),             # kron(W,A)^T
            pl.BlockSpec((1, coutl), lambda i: (0, 0)),                # bias row
        ],
        out_specs=pl.BlockSpec((None, block_n, coutl), lambda i: (i, 0, 0)),
        compiler_params=pltpu.CompilerParams(
            dimension_semantics=("parallel",),
        ),
    )(x_blk, mt, b_row)

    # (grid_n, block_n, Cout*L) -> (N, Cout, L, 1): free reshape.
    return out.reshape(n, cout, txt_length, 1)


def ms_block_reference(x_nchw, weight, bias, pool_level, txt_length):
    """Pure-JAX reference matching the PyTorch forward."""
    pool_k = 5 * pool_level
    n, cin, h, _ = x_nchw.shape
    h_pooled = (h - pool_k) // pool_k + 1
    x = x_nchw[:, :, : h_pooled * pool_k, 0]                  # (N, Cin, Hp*k)
    xp = x.reshape(n, cin, h_pooled, pool_k).mean(axis=3)     # (N, Cin, Hp)
    w_mat = weight[:, :, 0, 0]                                # (Cout, Cin)
    y = jnp.einsum("oc,nch->noh", w_mat, xp) + bias[None, :, None]
    y = jnp.maximum(y, 0.0)                                   # (N, Cout, Hp)
    idx = jnp.asarray(_nearest_src_indices(h_pooled, txt_length), dtype=jnp.int32)
    y = y[:, :, idx]                                          # nearest upsample
    return y[..., None]                                       # (N, Cout, L, 1)


if __name__ == "__main__":
    # small, MSnet-consistent shapes
    batch = 2
    in_channel = 4
    out_channel = 8
    pool_level = 1           # pool kernel = 5
    txt_length = 20          # input H == txt_length, as in MSnet text branch

    key = jax.random.PRNGKey(0)
    kx, kw = jax.random.split(key)

    x = jax.random.normal(kx, (batch, in_channel, txt_length, 1), dtype=jnp.float32)
    # Conv2d init: weight ~ N(0, 0.01), bias = 0
    weight = 0.01 * jax.random.normal(
        kw, (out_channel, in_channel, 1, 1), dtype=jnp.float32
    )
    bias = jnp.zeros((out_channel,), dtype=jnp.float32)

    fwd = functools.partial(
        ms_block_forward, pool_level=pool_level, txt_length=txt_length
    )
    out = fwd(x, weight, bias)
    out = jax.block_until_ready(out)

    ref = ms_block_reference(x, weight, bias, pool_level, txt_length)
    assert out.shape == (batch, out_channel, txt_length, 1), out.shape
    assert jnp.allclose(out, ref, atol=1e-5, rtol=1e-5), "mismatch vs reference"

    print("KERNEL_OK")
</pallas_src>

<mosaic_0001>
module attributes {stable_mosaic.version = 11 : i64} {
  func.func @ms_block_kernel(%arg0: i32, %arg1: memref<1x1x80xf32, #tpu.memory_space<vmem>>, %arg2: memref<80x160xf32, #tpu.memory_space<vmem>>, %arg3: memref<1x160xf32, #tpu.memory_space<vmem>>, %arg4: memref<1x1x160xf32, #tpu.memory_space<vmem>>) attributes {dimension_semantics = [#tpu.dimension_semantics<parallel>], iteration_bounds = array<i64: 2>, scalar_prefetch = 0 : i64, scratch_operands = 0 : i64, tpu.core_type = #tpu.core_type<tc>, window_params = [{transform_indices = @transform_0, window_bounds = array<i64: 1, 1, 80>}, {pipeline_mode = #tpu.pipeline_mode<synchronous>, transform_indices = @transform_1, window_bounds = array<i64: 80, 160>}, {pipeline_mode = #tpu.pipeline_mode<synchronous>, transform_indices = @transform_2, window_bounds = array<i64: 1, 160>}, {transform_indices = @transform_3, window_bounds = array<i64: 1, 1, 160>}]} {
    %c0 = arith.constant 0 : index
    %c0_0 = arith.constant 0 : index
    %c0_1 = arith.constant 0 : index
    %0 = vector.load %arg1[%c0, %c0_0, %c0_1] : memref<1x1x80xf32, #tpu.memory_space<vmem>>, vector<1x1x80xf32>
    %1 = vector.shape_cast %0 : vector<1x1x80xf32> to vector<1x80xf32>
    %c0_2 = arith.constant 0 : index
    %c0_3 = arith.constant 0 : index
    %2 = vector.load %arg2[%c0_2, %c0_3] : memref<80x160xf32, #tpu.memory_space<vmem>>, vector<80x160xf32>
    %cst = arith.constant dense<0.000000e+00> : vector<1x160xf32>
    %3 = tpu.matmul %1, %2, %cst {dimension_numbers = #tpu.dot_dimension_numbers<[1], [0], [0], [1], [0, 0, 1, 1], [], []>} : vector<1x80xf32>, vector<80x160xf32>, vector<1x160xf32> -> vector<1x160xf32>
    %cst_4 = arith.constant 2.000000e-01 : f32
    %4 = vector.broadcast %cst_4 : f32 to vector<1x160xf32>
    %5 = arith.mulf %3, %4 : vector<1x160xf32>
    %c0_5 = arith.constant 0 : index
    %c0_6 = arith.constant 0 : index
    %6 = vector.load %arg3[%c0_5, %c0_6] : memref<1x160xf32, #tpu.memory_space<vmem>>, vector<1x160xf32>
    %7 = arith.addf %5, %6 : vector<1x160xf32>
    %cst_7 = arith.constant 0.000000e+00 : f32
    %8 = vector.broadcast %cst_7 : f32 to vector<1x160xf32>
    %9 = arith.maximumf %7, %8 : vector<1x160xf32>
    %c0_8 = arith.constant 0 : index
    %c0_9 = arith.constant 0 : index
    %c0_10 = arith.constant 0 : index
    %10 = vector.load %arg4[%c0_8, %c0_9, %c0_10] : memref<1x1x160xf32, #tpu.memory_space<vmem>>, vector<1x1x160xf32>
    %11 = vector.shape_cast %10 : vector<1x1x160xf32> to vector<1x160xf32>
    %12 = vector.shape_cast %9 : vector<1x160xf32> to vector<1x1x160xf32>
    tpu.vector_store %arg4[%c0_8, %c0_9, %c0_10], %12 {strides = array<i32>} : memref<1x1x160xf32, #tpu.memory_space<vmem>>, vector<1x1x160xf32>,
    return
  }
  func.func @transform_0(%arg0: i32) -> (i32, i32, i32) {
    %c0_i32 = arith.constant 0 : i32
    %c0_i32_0 = arith.constant 0 : i32
    %c0_i32_1 = arith.constant 0 : i32
    return %arg0, %c0_i32, %c0_i32_0 : i32, i32, i32
  }
  func.func @transform_1(%arg0: i32) -> (i32, i32) {
    %c0_i32 = arith.constant 0 : i32
    %c0_i32_0 = arith.constant 0 : i32
    %c0_i32_1 = arith.constant 0 : i32
    return %c0_i32, %c0_i32_0 : i32, i32
  }
  func.func @transform_2(%arg0: i32) -> (i32, i32) {
    %c0_i32 = arith.constant 0 : i32
    %c0_i32_0 = arith.constant 0 : i32
    %c0_i32_1 = arith.constant 0 : i32
    return %c0_i32, %c0_i32_0 : i32, i32
  }
  func.func @transform_3(%arg0: i32) -> (i32, i32, i32) {
    %c0_i32 = arith.constant 0 : i32
    %c0_i32_0 = arith.constant 0 : i32
    %c0_i32_1 = arith.constant 0 : i32
    return %arg0, %c0_i32, %c0_i32_0 : i32, i32, i32
  }
}

</mosaic_0001>

<bundles_post_ra>
// kernel: tpu_custom_call.1
= control target key start
LH: loop header
LB: loop body
LE: loop exit
PB: predicated region body
PF: predicated region fallthrough
CT: control target
= control target key end

     0   :  { %8 = vsyncpa [#allocation3], 0  ;;  %s882_s0 = inlined_call_operand.hbm [shape: f32[2,1,80], index: 0, kind: input, shape index: {}]   ;;  %s883_s1 = inlined_call_operand.hbm [shape: f32[80,160], index: 1, kind: input, shape index: {}]   ;;  %s884_s2 = inlined_call_operand.vmem [shape: f32[1,160], index: 2, kind: input, shape index: {}]   ;;  %s885_s3 = inlined_call_operand.hbm [shape: f32[2,1,160], index: 3, kind: output, shape index: {}]  }
   0x1   :  { %10 = vsyncpa [#allocation3 + $0x1], 0 }
   0x2   :  { %11 = vsyncpa [#allocation6], 0 }
   0x3   :  { %12 = vsyncpa [#allocation4], 0 }
   0x4   :  { %14 = vsyncpa [#allocation4 + $0x1], 0  ;;  %s680_s12 = smov 0   ;;  %s682_s13 = smov 0  }
   0x5   :  { %s684_s14 = smov 0   ;;  %s686_s15 = smov 0  }
   0x6 LB: > { %s701_s16 = sadd.s32 4294967295, %s651_s15   ;;  %s427_s17 = sadd.s32 4294967294, %s651_s15   ;;  %s651_s15 = sphi %s686_s15, %s905_s15   ;;  %s647_s14 = sphi %s684_s14, %s904_s14   ;;  %s643_s13 = sphi %s682_s13, %s903_s13   ;;  %s639_s12 = sphi %s680_s12, %s902_s12  }
   0x7   : > { %p40_p0 = scmp.ne.s32.totalorder %s643_s13, %s639_s12  ;;  %p886_p1 = scmp.eq.s32.totalorder %s701_s16, 0 }
   0x8   : > { %p112_p3 = scmp.eq.s32.totalorder %s427_s17, 1  ;;  %p428_p5 = scmp.ge.s32.totalorder %s651_s15, 1 }
   0x9   : > { %p710_p4 = por %p886_p1, %p40_p0  ;;  %p119_p7 = scmp.lt.s32.totalorder %s651_s15, 3 }
   0xa   : > { %p715_p6 = por %p112_p3, %p40_p0  ;;  %s653_s21 = smov [#allocation5]  }
   0xb   : > { %s889_s18 = scalar_select %p710_p4, 1, 0 }
   0xc   : > { %s890_s19 = scalar_select %p715_p6, 1, 0 }
   0xd   : > { %p720_p8 = pnand %p428_p5, %p119_p7  ;;  %s131_s22 = sshll.u32 %s653_s21, 4  ;;  %s724_s22 = int_to_ptr.vmem [resolvable:$true] %s131_s22 }
   0xe   : > { %s736_s24 = sadd.s32 1, %s651_s15   ;;  %s27_s25 = sadd.s32 1, %s647_s14 }
   0xf   : > { %s891_s20 = scalar_select %p720_p8, 1, 0 }
  0x10   : > { %p470_p9 = pneg %p720_p8  ;;  %s24_s26 = ssub.s32 %s651_s15, %s736_s24 }
  0x11   : > { %s523_s29 = scalar_lea.hbm %s883_s1, 2560 }
  0x12   : > { %p731_p11 = pnand %p470_p9, %p886_p1  ;;  %p524_p12 = scmp.ne.s32.totalorder %s883_s1, %s523_s29 }
  0x13   : > { %p530_p5 = scmp.lt.u32.totalorder %s523_s29, %s883_s1 }
  0x14   : > { %p525_p13 = pneg %p731_p11 }
  0x16   : > { %p526_p0 = pnand %p525_p13, %p524_p12 }
  0x18   : > { %p527_p3 = pneg %p526_p0 }
  0x1a   : > { %p532_p7 = pnand %p530_p5, %p527_p3 }
  0x1c   : > { %535 = shalt.err (!%p532_p7)
}
  0x1d   : > { %s536_s7 = scalar_lea.vmem %s724_s22, 2560  ;;  %p544_p2 = scmp.lt.s32.totalorder %s724_s22, %s724_s22 }
  0x1e   : > { %p537_p9 = scmp.ne.s32.totalorder %s724_s22, %s536_s7  ;;  %p545_p6 = scmp.lt.s32.totalorder %s536_s7, %s536_s7 }
  0x20   : > { %p539_p10 = pnand %p537_p9, %p525_p13  ;;  %p546_p4 = por %p545_p6, %p544_p2 }
  0x22   : > { %p540_p1 = pneg %p539_p10 }
  0x24   : > { %p547_p8 = pnand %p546_p4, %p540_p1 }
  0x26   : > { %550 = shalt.err (!%p547_p8)
}
  0x27   : > { %s654_s8 = smov 256   ;;  %s655_s9 = smov 16  }
  0x28   : > { %473 = dma.hbm_to_vmem [thread:$0]  (!%p731_p11), %s883_s1, 2560, %s724_s22, [#allocation6], %s654_s8, %s654_s8, %s655_s9  }
  0x29   : > { %p25_p2 = scmp.eq.s32.totalorder %s24_s26, 0  ;;  %p34_p1 = scmp.ne.s32.totalorder %s647_s14, %s643_s13 }
  0x2a   : > { %p35_p4 = scmp.eq.s32.totalorder %s651_s15, 0  ;;  %p483_p6 = scmp.lt.s32.totalorder %s651_s15, 2 }
  0x2b   : > { %s767_s17 = scalar_select %p25_p2, %s647_s14, %s27_s25  }
  0x2c   : > { %p36_p8 = por %p35_p4, %p34_p1  ;;  %p893_p10 = scmp.eq.s32.totalorder %s701_s16, 1 }
  0x2d   : > { %s148_s27 = sand.u32 1, %s647_s14   ;;  %s431_s28 = sshll.u32 %s651_s15, 4 }
  0x2e   : > { %p771_p12 = por %p893_p10, %p34_p1  ;;  %s780_s30 = scalar_lea.hbm %s882_s0, %s431_s28 }
  0x2f   : > { %s151_s22 = scalar_lea.vmem [#allocation2], %s148_s27  ;;  %p784_p11 = pnand %p483_p6, %p36_p8 }
  0x30   : > { %s158_s25 = sshll.u32 %s151_s22, 4  ;;  %s149_s4 = scalar_lea.sflag [#allocation3], %s148_s27  ;;  %s782_s25 = int_to_ptr.vmem [resolvable:$true] %s158_s25 }
  0x31   : > { %s551_s5 = scalar_lea.hbm %s780_s30, 16  ;;  %p553_p0 = pneg %p784_p11 }
  0x32   : > { %p552_p13 = scmp.ne.s32.totalorder %s780_s30, %s551_s5  ;;  %s556_s8 = scalar_lea.hbm %s882_s0, 32 }
  0x33   : > { %p557_p7 = scmp.lt.u32.totalorder %s780_s30, %s882_s0  ;;  %p558_p9 = scmp.lt.u32.totalorder %s556_s8, %s551_s5 }
  0x34   : > { %p554_p3 = pnand %p553_p0, %p552_p13  ;;  %p560_p1 = scmp.lt.u32.totalorder %s551_s5, %s780_s30 }
  0x35   : > { %p559_p2 = por %p558_p9, %p557_p7 }
  0x36   : > { %p555_p5 = pneg %p554_p3 }
  0x37   : > { %p561_p4 = por %p560_p1, %p559_p2 }
  0x39   : > { %p562_p6 = pnand %p561_p4, %p555_p5 }
  0x3b   : > { %565 = shalt.err (!%p562_p6)
}
  0x3c   : > { %s566_s11 = scalar_lea.vmem %s782_s25, 16  ;;  %s656_s27 = smov [#allocation2]  }
  0x3d   : > { %p567_p8 = scmp.ne.s32.totalorder %s782_s25, %s566_s11  ;;  %s571_s28 = sshll.u32 %s656_s27, 4  ;;  %s572_s28 = int_to_ptr.vmem [resolvable:$false] %s571_s28 }
  0x3e   : > { %s573_s29 = scalar_lea.vmem %s572_s28, 32  ;;  %p574_p3 = scmp.lt.s32.totalorder %s782_s25, %s572_s28 }
  0x3f   : > { %p569_p10 = pnand %p567_p8, %p553_p0  ;;  %p575_p7 = scmp.lt.s32.totalorder %s573_s29, %s566_s11 }
  0x41   : > { %p570_p13 = pneg %p569_p10  ;;  %p576_p9 = por %p575_p7, %p574_p3 }
  0x43   : > { %p577_p2 = pnand %p576_p9, %p570_p13 }
  0x45   : > { %580 = shalt.err (!%p577_p2)
}
  0x46   : > { %477 = dma.hbm_to_vmem [thread:$0]  (!%p784_p11), %s780_s30, 16, %s782_s25, %s149_s4  }
  0x47   : > { %p896_p5 = scmp.ne.s32.totalorder %s891_s20, 0 }
  0x48   : > { %s816_s23 = sand.u32 (!%p896_p5), 1, %s643_s13   ;;  %p897_p0 = scmp.ne.s32.totalorder (!%p896_p5), %s889_s18, 0 }
  0x49   : > { %167 = sbr.rel (%p896_p5) target bundleno = 346 (0x15a), region = 32  ;;  %s170_s22 = scalar_lea.sflag (!%p896_p5), [#allocation3], %s816_s23 }
  0x4a   : > { %s172_s5 = scalar_lea.vmem (!%p896_p5), [#allocation2], %s816_s23 }
  0x50   : > { %626 = dma.done.wait (%p897_p0), %s170_s22, 16  }
  0x51   : > { %628 = vsyncadd (%p897_p0), %s170_s22, 4294967280  ;;  %p898_p1 = scmp.eq.s32.totalorder %s701_s16, 0 }
  0x53   : > { %630 = dma.done.wait (%p898_p1), [#allocation6], 2560   ;;  %p899_p11 = pmov %p898_p1 }
  0x54   : > { %v657_v0 = vmov 0.0   ;;  %v200_v1 = vld [vmem:[#allocation5 + $0x8] sm:$0xff]  ;;  %v202_v2 = vld [vmem:[#allocation5 + $0x18] sm:$0xff]  ;;  %v199_v3 = vld [vmem:[#allocation5] sm:$0xff]  ;;  %vm219_vm0 = vcmask 654336   ;;  %v298_v32 = vlaneseq  ;;  %s434_s30 = sshll.u32 %s816_s23, 1 }
  0x55   : > { %632 = vsyncadd (%p899_p11), [#allocation6], 4294964736  ;;  %287 = vmatprep.mubr.f32.mxu0 %v657_v0  ;;  %v442_v4 = vpack.c.bf16 %v202_v2, %v200_v1  ;;  %v201_v5 = vld [vmem:[#allocation5 + $0x10] sm:$0xff]  ;;  %v204_v6 = vld [vmem:[#allocation5 + $0x28] sm:$0xff]  ;;  %v658_v37 = vmov 1966171168  }
  0x56   : > { %v206_v7 = vld [vmem:[#allocation5 + $0x38] sm:$0xff]  ;;  %v444_v8 = vpack.c.bf16 %v201_v5, %v199_v3  ;;  %v203_v10 = vld [vmem:[#allocation5 + $0x20] sm:$0xff]  ;;  %v205_v11 = vld [vmem:[#allocation5 + $0x30] sm:$0xff]  ;;  %v299_v33 = vshrl.u32 %v298_v32, 7  ;;  %v316_v38 = vunpack.c.l.s4 %v658_v37  ;;  %s441_s25 = sshll.u32 %s701_s16, 5  ;;  %s197_s26 = scalar_lea.vmem [#allocation7], %s434_s30 }
  0x57   : > { %v446_v9 = vpack.c.bf16 %v206_v7, %v204_v6  ;;  %v208_v12 = vld [vmem:[#allocation5 + $0x48] sm:$0xff]  ;;  %443 = vmatprep.subr.bf16.mxu0 %v442_v4  ;;  %v210_v13 = vld [vmem:[#allocation5 + $0x58] sm:$0xff]  ;;  %v448_v14 = vpack.c.bf16 %v205_v11, %v203_v10  ;;  %v207_v16 = vld [vmem:[#allocation5 + $0x40] sm:$0xff]  ;;  %s350_s4 = sshll.u32 %s197_s26, 4  ;;  %vm332_vm1 = vcmp.lt.s32.totalorder %v298_v32, 160  ;;  %s838_s8 = scalar_lea.hbm %s885_s3, %s441_s25  ;;  %s840_s4 = int_to_ptr.vmem [resolvable:$true] %s350_s4 }
  0x58   : > { %445 = vmatpush1.bf16.msra.mxu0 %v444_v8  ;;  %v450_v15 = vpack.c.bf16 %v210_v13, %v208_v12  ;;  %v209_v17 = vld [vmem:[#allocation5 + $0x50] sm:$0xff]  ;;  %v212_v18 = vld [vmem:[#allocation5 + $0x68] sm:$0xff]  ;;  %v214_v19 = vld [vmem:[#allocation5 + $0x78] sm:$0xff]  ;;  %v300_v34 = vsub.s32 0, %v299_v33  ;;  %v304_v36 = vsub.s32 1, %v299_v33  ;;  %v317_v45 = vunpack.c.0.s8 %v316_v38  ;;  %s336_s9 = scalar_lea.sflag [#allocation4], %s816_s23 }
  0x59   : > { %447 = vmatprep.subr.bf16.mxu0 %v446_v9  ;;  %v452_v20 = vpack.c.bf16 %v209_v17, %v207_v16  ;;  %v454_v21 = vpack.c.bf16 %v214_v19, %v212_v18  ;;  %v211_v22 = vld [vmem:[#allocation5 + $0x60] sm:$0xff]  ;;  %v213_v23 = vld [vmem:[#allocation5 + $0x70] sm:$0xff]  ;;  %v216_v24 = vld [vmem:[#allocation5 + $0x88] sm:$0xff]  ;;  %s581_s10 = scalar_lea.vmem %s840_s4, 32  ;;  %s659_s16 = smov [#allocation7]  }
  0x5a   : > { %v218_v25 = vld [vmem:[#allocation5 + $0x98] sm:$0xff]  ;;  %v456_v26 = vpack.c.bf16 %v213_v23, %v211_v22  ;;  %v215_v28 = vld [vmem:[#allocation5 + $0x80] sm:$0xff]  ;;  %v217_v29 = vld [vmem:[#allocation5 + $0x90] sm:$0xff]  ;;  %v320_v50 = vsub.s32 %v317_v45, %v299_v33  ;;  %p582_p4 = scmp.ne.s32.totalorder %s840_s4, %s581_s10  ;;  %s585_s11 = sshll.u32 %s659_s16, 4  ;;  %s586_s11 = int_to_ptr.vmem [resolvable:$false] %s585_s11 }
  0x5b   : > { %v458_v27 = vpack.c.bf16 %v218_v25, %v216_v24  ;;  %v460_v30 = vpack.c.bf16 %v217_v29, %v215_v28  ;;  %v198_v31 = vld [vmem:[%s172_s5] sm:$0x1]  ;;  %s587_s27 = scalar_lea.vmem %s586_s11, 64  ;;  %p588_p10 = scmp.lt.s32.totalorder %s840_s4, %s586_s11 }
  0x5c   : > { %449 = vmatpush1.bf16.msra.mxu0 %v448_v14  ;;  %v296_v35 = vld [vmem:[%s884_s2] sm:$0x3]  ;;  %p583_p6 = pnand %p582_p4, %p771_p12  ;;  %p589_p13 = scmp.lt.s32.totalorder %s587_s27, %s581_s10 }
  0x5d   : > { %451 = vmatprep.subr.bf16.mxu0 %v450_v15  ;;  %v301_v39 = vrot.slane %v296_v35, %v300_v34  ;;  %v305_v41 = vrot.slane %v296_v35, %v304_v36 }
  0x5e   : > { %p584_p8 = pneg %p583_p6  ;;  %p590_p3 = por %p589_p13, %p588_p10 }
  0x60   : > { %453 = vmatpush1.bf16.msra.mxu0 %v452_v20  ;;  %p591_p7 = pnand %p590_p3, %p584_p8 }
  0x61   : > { %455 = vmatprep.subr.bf16.mxu0 %v454_v21 }
  0x64   : > { %457 = vmatpush1.bf16.msra.mxu0 %v456_v26 }
  0x65   : > { %459 = vmatprep.subr.bf16.mxu0 %v458_v27 }
  0x68   : > { %461 = vmatpush1.bf16.msra.mxu0 %v460_v30 }
  0x6b   : > { %435 = vmatmul.mubr.msk.f32.vlgmr.msra.gmra.mrb[0].mxu0 %vm219_vm0, %v198_v31 }
 0x13e   : > { %v289_v40 = vpop.f32.mrb[0].mxu0 }
 0x13f   : > { %v294_v42 = vmul.f32 0.2, %v289_v40  ;;  %v291_v43 = vpop.f32.mrb[1].mxu0 }
 0x140   : > { %v295_v44 = vmul.f32 0.2, %v291_v43 }
 0x141   : > { %v308_v46 = vadd.f32 %v301_v39, %v294_v42 }
 0x142   : > { %v309_v47 = vadd.f32 %v305_v41, %v295_v44 }
 0x143   : > { %v310_v48 = vmax.f32 %v308_v46, 0.0 }
 0x144   : > { %v311_v49 = vmax.f32 %v309_v47, 0.0 }
 0x146   : > { %v314_v51 = vcombine.low %v310_v48, %v311_v49 }
 0x148   : > { %v321_v52 = vrot.slane %v314_v51, %v320_v50 }
 0x14a   : > { %v328_v53 = vrot.slane %v321_v52, %v320_v50 }
 0x14c   : > { %334 = vst.msk [vmem:[%s197_s26] sm:$0x3] %vm332_vm1, %v328_v53 }
 0x14d   : > { %594 = shalt.err (!%p591_p7)
}
 0x14e   : > { %s595_s28 = scalar_lea.hbm %s838_s8, 32  ;;  %s599_s22 = scalar_lea.hbm %s885_s3, 64 }
 0x14f   : > { %p596_p9 = scmp.ne.s32.totalorder %s838_s8, %s595_s28  ;;  %p600_p0 = scmp.lt.u32.totalorder %s838_s8, %s885_s3 }
 0x150   : > { %p601_p1 = scmp.lt.u32.totalorder %s599_s22, %s595_s28  ;;  %p603_p4 = scmp.lt.u32.totalorder %s595_s28, %s838_s8 }
 0x151   : > { %p597_p2 = pnand %p596_p9, %p771_p12 }
 0x152   : > { %p602_p11 = por %p601_p1, %p600_p0 }
 0x153   : > { %p598_p5 = pneg %p597_p2 }
 0x154   : > { %p604_p6 = por %p603_p4, %p602_p11 }
 0x156   : > { %p605_p8 = pnand %p604_p6, %p598_p5 }
 0x158   : > { %608 = shalt.err (!%p605_p8)
}
 0x159   : > { %468 = dma.vmem_to_hbm [thread:$0]  (%p771_p12), %s840_s4, 32, %s838_s8, %s336_s9  }
 0x15a PF: > { %s362_s20 = sand.u32 1, %s639_s12   ;;  %p900_p10 = scmp.ne.s32.totalorder %s890_s19, 0 }
 0x15b   : > { %p901_p13 = scmp.ge.s32.totalorder %s651_s15, 2  ;;  %s363_s30 = scalar_lea.sflag [#allocation4], %s362_s20 }
 0x15d   : > { %p479_p3 = pnand %p901_p13, %p900_p10 }
 0x15f   : > { %634 = dma.done.wait (!%p479_p3), %s363_s30, 32  }
 0x160   : > { %636 = vsyncadd (!%p479_p3), %s363_s30, 4294967264  ;;  %p17_p7 = scmp.ge.s32.totalorder %s736_s24, 4   ;;  %s902_s12 = smov %s643_s13 }
 0x161   : > { %s903_s13 = smov %s647_s14  ;;  %s904_s14 = smov %s767_s17 }
 0x162   : > { %s905_s15 = smov %s736_s24  ;;  %19 = sbr.rel (!%p17_p7) target bundleno = 6 (0x6), region = 81 }
 0x169   :  { %368 = vsyncpa [#allocation3], 1 }
 0x16a   :  { %370 = vsyncpa [#allocation3 + $0x1], 1 }
 0x16b   :  { %371 = vsyncpa [#allocation6], 1 }
 0x16c   :  { %372 = vsyncpa [#allocation4], 1 }
 0x16d   :  { %374 = vsyncpa [#allocation4 + $0x1], 1 }

</bundles_post_ra>
